<compile_context>
chip_gen: v7x
topology: tpu7x:2x2x1
jax: 0.10.0
libtpu: 0.0.40
codegen_flags: <defaults>
</compile_context>

<pallas_src>
import jax
import jax.numpy as jnp
from jax.experimental import pallas as pl
from jax.experimental.pallas import tpu as pltpu

OUT_FEATURES = 256  # nn.Linear(hidden_dim, 256)


def _round_up(x, m):
    return ((x + m - 1) // m) * m


def _cdiv(a, b):
    return (a + b - 1) // b


def _mlp_head_kernel(x_ref, w_ref, b_ref, o_ref):
    """Fused Linear + (folded) BatchNorm1d(eval) + ReLU for one row-tile.

    x_ref: (tm, H)    f32 activations tile (cast to bf16 in-kernel; no HBM round-trip)
    w_ref: (H, 256)   bf16 BN-folded linear weight ([in, out] layout)
    b_ref: (1, 256)   f32 BN-folded bias
    o_ref: (tm, 256)  output tile (bf16 by default)
    """
    x = x_ref[...].astype(jnp.bfloat16)          # in-kernel cast, feeds the MXU
    y = jnp.dot(x, w_ref[...], preferred_element_type=jnp.float32)
    y = jnp.maximum(y + b_ref[...], 0.0)         # bias (+ folded BN shift) + ReLU, f32
    # Dropout(p=0.2): identity in eval mode (see TODO above).
    o_ref[...] = y.astype(o_ref.dtype)


def _choose_row_tile(M, tm_max):
    """Pick the row tile: multiple of 256 (MXU edge) when possible, else 16.

    Prefers an even tile count (balances v7x's two TensorCores under
    dimension_semantics=("parallel",)) by *shrinking* the tile rather than
    appending a zero tile, so 1-TC chips (v5e/v6e) pay nothing extra.
    """
    if M <= tm_max:
        return _round_up(M, 16)                  # one tile covers everything
    tm = (tm_max // 256) * 256 if tm_max >= 256 else _round_up(tm_max, 16)
    n = _cdiv(M, tm)
    if n > 1 and n % 2 == 1 and tm > 256:
        tm_alt = _round_up(_cdiv(M, n + 1), 256)
        if tm_alt >= 256 and _cdiv(M, tm_alt) % 2 == 0:
            tm = tm_alt
    return tm


def audio_stream_forward(x, w, b, gamma, beta, running_mean, running_var,
                         eps=1e-5, tm=2048, out_dtype=jnp.bfloat16):
    """x: [B, T, H] float32 (wav2vec2 last_hidden_state). Returns [B, T, 256]."""
    B, T, H = x.shape
    M = B * T

    # --- Fold eval-mode BatchNorm into the linear weight / bias (host-side glue) ---
    scale = gamma / jnp.sqrt(running_var + eps)              # [256]
    w_eff = (w * scale[None, :]).astype(jnp.bfloat16)        # [H, 256]
    b_eff = (b * scale + beta - running_mean * scale).reshape(
        1, OUT_FEATURES).astype(jnp.float32)                 # [1, 256], f32 epilogue

    # --- Rows flattened in producer dtype; no pad, ragged last tile is masked ---
    x2 = x.reshape(M, H)

    # --- Row tile + VMEM budget (with the dtypes that actually enter the kernel) ---
    tm_eff = _choose_row_tile(M, tm)
    itemsize_x = x2.dtype.itemsize
    itemsize_o = jnp.dtype(out_dtype).itemsize

    def vmem_bytes(t):
        bytes_x = 2 * t * H * itemsize_x                     # double-buffered x tile
        bytes_o = 2 * t * OUT_FEATURES * itemsize_o          # double-buffered out tile
        bytes_w = 2 * H * OUT_FEATURES * 2                   # resident bf16 weight
        bytes_b = 2 * 8 * OUT_FEATURES * 4                   # bias, sublane-padded
        return bytes_x + bytes_o + bytes_w + bytes_b

    # Keep <= ~48 MiB so there is compiler-scratch headroom under v7x's 64 MiB.
    while vmem_bytes(tm_eff) > (48 << 20) and tm_eff > 256:
        tm_eff = max((tm_eff // 2 // 256) * 256, 256)

    num_tiles = _cdiv(M, tm_eff)
    vmem_limit = int(min(max(vmem_bytes(tm_eff) + (2 << 20), 16 << 20), 64 << 20))

    cost = pl.CostEstimate(
        flops=2 * M * H * OUT_FEATURES,
        transcendentals=0,
        bytes_accessed=(M * H * itemsize_x + H * OUT_FEATURES * 2
                        + M * OUT_FEATURES * itemsize_o),
    )

    out = pl.pallas_call(
        _mlp_head_kernel,
        out_shape=jax.ShapeDtypeStruct((M, OUT_FEATURES), out_dtype),
        grid_spec=pltpu.PrefetchScalarGridSpec(
            num_scalar_prefetch=0,
            grid=(num_tiles,),
            in_specs=[
                pl.BlockSpec((tm_eff, H), lambda i: (i, 0)),            # x tile (f32)
                pl.BlockSpec((H, OUT_FEATURES), lambda i: (0, 0)),      # weight (resident)
                pl.BlockSpec((1, OUT_FEATURES), lambda i: (0, 0)),      # folded bias
            ],
            out_specs=pl.BlockSpec((tm_eff, OUT_FEATURES), lambda i: (i, 0)),
        ),
        compiler_params=pltpu.CompilerParams(
            dimension_semantics=("parallel",),
            vmem_limit_bytes=vmem_limit),
        cost_estimate=cost,
    )(x2, w_eff, b_eff)

    return out.reshape(B, T, OUT_FEATURES)


def _reference_forward(x, w, b, gamma, beta, running_mean, running_var, eps=1e-5):
    """Pure-JAX f32 reference of the same eval-mode mlp_head."""
    y = jnp.einsum("bth,ho->bto", x, w) + b
    y = (y - running_mean) / jnp.sqrt(running_var + eps) * gamma + beta
    return jnp.maximum(y, 0.0)


def _reference_forward_matched(x, w, b, gamma, beta, running_mean, running_var,
                               eps=1e-5, out_dtype=jnp.bfloat16):
    """Reference with the same bf16 quantization + BN folding the kernel uses."""
    scale = gamma / jnp.sqrt(running_var + eps)
    w_eff = (w * scale[None, :]).astype(jnp.bfloat16)
    b_eff = b * scale + beta - running_mean * scale
    y = jnp.einsum("bth,ho->bto", x.astype(jnp.bfloat16), w_eff,
                   preferred_element_type=jnp.float32) + b_eff
    return jnp.maximum(y, 0.0).astype(out_dtype)


if __name__ == "__main__":
    key = jax.random.PRNGKey(0)
    B, T, H = 2, 8, 32  # small shapes: batch=2, seq=8, hidden=32

    k_x, k_w, k_b, k_g, k_be, k_m, k_v = jax.random.split(key, 7)

    # "last_hidden_state" stand-in (extractor output), see TODO above.
    x = jax.random.normal(k_x, (B, T, H), dtype=jnp.float32)

    # Deterministic parameter init (shapes from nn.Linear(H, 256) + BatchNorm1d(256)).
    w = jax.random.normal(k_w, (H, OUT_FEATURES), dtype=jnp.float32) * 0.02
    b = jax.random.normal(k_b, (OUT_FEATURES,), dtype=jnp.float32) * 0.01
    gamma = 1.0 + 0.1 * jax.random.normal(k_g, (OUT_FEATURES,), dtype=jnp.float32)
    beta = 0.1 * jax.random.normal(k_be, (OUT_FEATURES,), dtype=jnp.float32)
    running_mean = 0.1 * jax.random.normal(k_m, (OUT_FEATURES,), dtype=jnp.float32)
    running_var = 1.0 + 0.1 * jax.nn.softplus(
        jax.random.normal(k_v, (OUT_FEATURES,), dtype=jnp.float32))

    out = audio_stream_forward(x, w, b, gamma, beta, running_mean, running_var)
    out = jax.block_until_ready(out)
    assert out.shape == (B, T, OUT_FEATURES), out.shape

    # Numerics-matched reference (same bf16 quantization + BN folding + bf16 out).
    ref_matched = _reference_forward_matched(
        x, w, b, gamma, beta, running_mean, running_var)
    assert jnp.allclose(out.astype(jnp.float32), ref_matched.astype(jnp.float32),
                        atol=1e-2, rtol=1e-2), "mismatch vs bf16-matched reference"

    # Semantic check vs. the full-f32 eval-mode module (bf16 quantization budget).
    ref = _reference_forward(x, w, b, gamma, beta, running_mean, running_var)
    assert jnp.allclose(out.astype(jnp.float32), ref, atol=3e-2, rtol=3e-2), \
        "mismatch vs f32 reference"

    print("KERNEL_OK")
</pallas_src>

<mosaic_0001>
module attributes {stable_mosaic.version = 11 : i64} {
  func.func @_mlp_head_kernel(%arg0: i32, %arg1: memref<16x32xf32, #tpu.memory_space<vmem>>, %arg2: memref<32x256xbf16, #tpu.memory_space<vmem>>, %arg3: memref<1x256xf32, #tpu.memory_space<vmem>>, %arg4: memref<16x256xbf16, #tpu.memory_space<vmem>>) attributes {dimension_semantics = [#tpu.dimension_semantics<parallel>], iteration_bounds = array<i64: 1>, scalar_prefetch = 0 : i64, scratch_operands = 0 : i64, tpu.core_type = #tpu.core_type<tc>, window_params = [{transform_indices = @transform_0, window_bounds = array<i64: 16, 32>}, {pipeline_mode = #tpu.pipeline_mode<synchronous>, transform_indices = @transform_1, window_bounds = array<i64: 32, 256>}, {pipeline_mode = #tpu.pipeline_mode<synchronous>, transform_indices = @transform_2, window_bounds = array<i64: 1, 256>}, {transform_indices = @transform_3, window_bounds = array<i64: 16, 256>}]} {
    %c0 = arith.constant 0 : index
    %c0_0 = arith.constant 0 : index
    %0 = vector.load %arg1[%c0, %c0_0] : memref<16x32xf32, #tpu.memory_space<vmem>>, vector<16x32xf32>
    %1 = arith.truncf %0 : vector<16x32xf32> to vector<16x32xbf16>
    %c0_1 = arith.constant 0 : index
    %c0_2 = arith.constant 0 : index
    %2 = vector.load %arg2[%c0_1, %c0_2] : memref<32x256xbf16, #tpu.memory_space<vmem>>, vector<32x256xbf16>
    %cst = arith.constant dense<0.000000e+00> : vector<16x256xf32>
    %3 = tpu.matmul %1, %2, %cst {dimension_numbers = #tpu.dot_dimension_numbers<[1], [0], [0], [1], [0, 0, 1, 1], [], []>} : vector<16x32xbf16>, vector<32x256xbf16>, vector<16x256xf32> -> vector<16x256xf32>
    %c0_3 = arith.constant 0 : index
    %c0_4 = arith.constant 0 : index
    %4 = vector.load %arg3[%c0_3, %c0_4] : memref<1x256xf32, #tpu.memory_space<vmem>>, vector<1x256xf32>
    %5 = vector.broadcast %4 : vector<1x256xf32> to vector<16x256xf32>
    %6 = arith.addf %3, %5 : vector<16x256xf32>
    %cst_5 = arith.constant 0.000000e+00 : f32
    %7 = vector.broadcast %cst_5 : f32 to vector<16x256xf32>
    %8 = arith.maximumf %6, %7 : vector<16x256xf32>
    %9 = arith.truncf %8 : vector<16x256xf32> to vector<16x256xbf16>
    %c0_6 = arith.constant 0 : index
    %c0_7 = arith.constant 0 : index
    %10 = vector.load %arg4[%c0_6, %c0_7] : memref<16x256xbf16, #tpu.memory_space<vmem>>, vector<16x256xbf16>
    tpu.vector_store %arg4[%c0_6, %c0_7], %9 {strides = array<i32>} : memref<16x256xbf16, #tpu.memory_space<vmem>>, vector<16x256xbf16>,
    return
  }
  func.func @transform_0(%arg0: i32) -> (i32, i32) {
    %c0_i32 = arith.constant 0 : i32
    %c0_i32_0 = arith.constant 0 : i32
    return %arg0, %c0_i32 : i32, i32
  }
  func.func @transform_1(%arg0: i32) -> (i32, i32) {
    %c0_i32 = arith.constant 0 : i32
    %c0_i32_0 = arith.constant 0 : i32
    %c0_i32_1 = arith.constant 0 : i32
    return %c0_i32, %c0_i32_0 : i32, i32
  }
  func.func @transform_2(%arg0: i32) -> (i32, i32) {
    %c0_i32 = arith.constant 0 : i32
    %c0_i32_0 = arith.constant 0 : i32
    %c0_i32_1 = arith.constant 0 : i32
    return %c0_i32, %c0_i32_0 : i32, i32
  }
  func.func @transform_3(%arg0: i32) -> (i32, i32) {
    %c0_i32 = arith.constant 0 : i32
    %c0_i32_0 = arith.constant 0 : i32
    return %arg0, %c0_i32 : i32, i32
  }
}

</mosaic_0001>

<bundles_post_ra>
// kernel: tpu_custom_call.1
= control target key start
LH: loop header
LB: loop body
LE: loop exit
PB: predicated region body
PF: predicated region fallthrough
CT: control target
= control target key end

     0   :  { %8 = vsyncpa [#allocation3], 0  ;;  %s333_s0 = inlined_call_operand.hbm [shape: f32[16,32], index: 0, kind: input, shape index: {}]   ;;  %s334_s1 = inlined_call_operand.hbm [shape: bf16[32,256], index: 1, kind: input, shape index: {}]   ;;  %s335_s2 = inlined_call_operand.vmem [shape: f32[1,256], index: 2, kind: input, shape index: {}]   ;;  %s336_s3 = inlined_call_operand.hbm [shape: bf16[16,256], index: 3, kind: output, shape index: {}]  }
   0x1   :  { %9 = vsyncpa [#allocation6], 0 }
   0x2   :  { %10 = vsyncpa [#allocation4], 0  ;;  %s259_s12 = smov [#allocation2]   ;;  %s187_s16 = scalar_lea.hbm %s333_s0, 256 }
   0x3   :  { %s16_s13 = sshll.u32 %s259_s12, 4  ;;  %p188_p0 = scmp.ne.s32.totalorder %s333_s0, %s187_s16  ;;  %s17_s13 = int_to_ptr.vmem [resolvable:$true] %s16_s13 }
   0x4   :  { %p191_p1 = scmp.lt.u32.totalorder %s187_s16, %s333_s0 }
   0x6   :  { %p193_p2 = pnand %p191_p1, %p188_p0 }
   0x8   :  { %196 = shalt.err (!%p193_p2)
}
   0x9   :  { %s197_s21 = scalar_lea.vmem %s17_s13, 256  ;;  %p202_p4 = scmp.lt.s32.totalorder %s17_s13, %s17_s13 }
   0xa   :  { %p198_p3 = scmp.ne.s32.totalorder %s17_s13, %s197_s21  ;;  %p203_p5 = scmp.lt.s32.totalorder %s197_s21, %s197_s21 }
   0xc   :  { %p204_p6 = por %p203_p5, %p202_p4 }
   0xe   :  { %p205_p7 = pnand %p204_p6, %p198_p3 }
  0x10   :  { %208 = shalt.err (!%p205_p7)
}
  0x11   :  { %s260_s22 = smov 128   ;;  %s261_s23 = smov 8  }
  0x12   :  { %22 = dma.hbm_to_vmem [thread:$0]  %s333_s0, 256, %s17_s13, [#allocation3], %s260_s22, %s260_s22, %s261_s23  }
  0x13   :  { %s262_s26 = smov [#allocation5]   ;;  %s209_s30 = scalar_lea.hbm %s334_s1, 512 }
  0x14   :  { %s28_s27 = sshll.u32 %s262_s26, 4  ;;  %p210_p8 = scmp.ne.s32.totalorder %s334_s1, %s209_s30  ;;  %s29_s27 = int_to_ptr.vmem [resolvable:$true] %s28_s27 }
  0x15   :  { %p213_p9 = scmp.lt.u32.totalorder %s209_s30, %s334_s1 }
  0x17   :  { %p215_p10 = pnand %p213_p9, %p210_p8 }
  0x19   :  { %218 = shalt.err (!%p215_p10)
}
  0x1a   :  { %s219_s8 = scalar_lea.vmem %s29_s27, 512  ;;  %p224_p12 = scmp.lt.s32.totalorder %s29_s27, %s29_s27 }
  0x1b   :  { %p220_p11 = scmp.ne.s32.totalorder %s29_s27, %s219_s8  ;;  %p225_p13 = scmp.lt.s32.totalorder %s219_s8, %s219_s8 }
  0x1d   :  { %p226_p0 = por %p225_p13, %p224_p12 }
  0x1f   :  { %p227_p1 = pnand %p226_p0, %p220_p11 }
  0x21   :  { %230 = shalt.err (!%p227_p1)
}
  0x22   :  { %34 = dma.hbm_to_vmem [thread:$0]  %s334_s1, 512, %s29_s27, [#allocation6], %s260_s22, %s260_s22, %s261_s23  }
  0x23   :  { %253 = dma.done.wait [#allocation3], 256  }
  0x24   :  { %254 = vsyncadd [#allocation3], 4294967040 }
  0x25   :  { %255 = dma.done.wait [#allocation6], 512  }
  0x26   :  { %256 = vsyncadd [#allocation6], 4294966784  ;;  %v263_v0 = vmov 0   ;;  %v181_v1 = vld [vmem:[#allocation5 + $0x4] ss:$8 sps:$4 sm:$0xff]   ;;  %v44_v5 = vld [vmem:[#allocation2] sm:$0xff]  ;;  %v53_v8 = vlaneseq }
  0x27   :  { %119 = vmatprep.mubr.bf16.mxu0 %v263_v0  ;;  %v183_v2 = vld [vmem:[#allocation5] ss:$8 sps:$4 sm:$0xff]   ;;  %87 = vmatprep.subr.bf16.mxu0 %v181_v1  ;;  %v184_v3 = vld [vmem:[#allocation5 + $0x14] ss:$8 sps:$4 sm:$0xff]   ;;  %v186_v4 = vld [vmem:[#allocation5 + $0x10] ss:$8 sps:$4 sm:$0xff]  }
  0x28   :  { %88 = vmatpush1.bf16.msra.mxu0 %v183_v2  ;;  %v45_v6 = vld [vmem:[#allocation2 + $0x8] sm:$0xff]  ;;  %vm83_vm0 = vcmask 261120   ;;  %v54_v9 = vshrl.u32 %v53_v8, 7  ;;  %v51_v11 = vld [vmem:[%s335_s2] sm:$0x3]  ;;  %s264_s11 = smov [#allocation7]  }
  0x29   :  { %89 = vmatprep.subr.bf16.mxu0 %v184_v3  ;;  %v46_v7 = vpack.c.bf16 %v45_v6, %v44_v5  ;;  %s153_s12 = sshll.u32 %s264_s11, 4  ;;  %s154_s12 = int_to_ptr.vmem [resolvable:$true] %s153_s12 }
  0x2a   :  { %v55_v10 = vsub.s32 0, %v54_v9  ;;  %v59_v12 = vsub.s32 1, %v54_v9  ;;  %s231_s2 = scalar_lea.vmem %s154_s12, 256  ;;  %p236_p3 = scmp.lt.s32.totalorder %s154_s12, %s154_s12 }
  0x2b   :  { %p232_p2 = scmp.ne.s32.totalorder %s154_s12, %s231_s2  ;;  %p237_p4 = scmp.lt.s32.totalorder %s231_s2, %s231_s2 }
  0x2c   :  { %90 = vmatpush1.bf16.msra.mxu0 %v186_v4  ;;  %v56_v13 = vrot.slane %v51_v11, %v55_v10  ;;  %v60_v14 = vrot.slane %v51_v11, %v59_v12 }
  0x2d   :  { %p238_p5 = por %p237_p4, %p236_p3 }
  0x2f   :  { %170 = vmatmul.mubr.msk.bf16.vlgmr.msra.gmra.mrb[0].mxu0 %vm83_vm0, %v46_v7  ;;  %p239_p6 = pnand %p238_p5, %p232_p2 }
 0x102   :  { %v121_v15 = vpop.f32.mrb[0].mxu0 }
 0x103   :  { %v122_v16 = vadd.f32 %v121_v15, %v56_v13  ;;  %v123_v17 = vpop.f32.mrb[1].mxu0 }
 0x104   :  { %v124_v18 = vadd.f32 %v123_v17, %v60_v14  ;;  %v125_v19 = vpop.f32.mrb[2].mxu0 }
 0x105   :  { %v130_v20 = vmax.f32 %v122_v16, 0.0  ;;  %v126_v21 = vadd.f32 %v125_v19, %v56_v13  ;;  %v127_v22 = vpop.f32.mrb[3].mxu0 }
 0x106   :  { %v131_v23 = vmax.f32 %v124_v18, 0.0  ;;  %v128_v24 = vadd.f32 %v127_v22, %v60_v14 }
 0x107   :  { %v132_v25 = vmax.f32 %v126_v21, 0.0 }
 0x108   :  { %v173_v26 = vpack.c.bf16 %v131_v23, %v130_v20  ;;  %v133_v27 = vmax.f32 %v128_v24, 0.0 }
 0x10a   :  { %146 = vst [vmem:[#allocation7] sm:$0xff] %v173_v26  ;;  %v174_v28 = vpack.c.bf16 %v133_v27, %v132_v25 }
 0x10c   :  { %147 = vst [vmem:[#allocation7 + $0x8] sm:$0xff] %v174_v28 }
 0x10d   :  { %242 = shalt.err (!%p239_p6)
}
 0x10e   :  { %s243_s15 = scalar_lea.hbm %s336_s3, 256 }
 0x10f   :  { %p244_p7 = scmp.ne.s32.totalorder %s336_s3, %s243_s15  ;;  %p247_p8 = scmp.lt.u32.totalorder %s243_s15, %s336_s3 }
 0x111   :  { %p249_p9 = pnand %p247_p8, %p244_p7 }
 0x113   :  { %252 = shalt.err (!%p249_p9)
}
 0x114   :  { %159 = dma.vmem_to_hbm [thread:$0]  %s154_s12, 256, %s336_s3, [#allocation4], %s260_s22, %s260_s22, %s261_s23  }
 0x115   :  { %257 = dma.done.wait [#allocation4], 256  }
 0x116   :  { %258 = vsyncadd [#allocation4], 4294967040 }
 0x117   :  { %163 = vsyncpa [#allocation3], 1 }
 0x118   :  { %164 = vsyncpa [#allocation6], 1 }
 0x119   :  { %165 = vsyncpa [#allocation4], 1 }

</bundles_post_ra>
